<compile_context>
chip_gen: v7x
topology: tpu7x:2x2x1
jax: 0.10.0
libtpu: 0.0.40
codegen_flags: <defaults>
</compile_context>

<pallas_src>
import functools

import jax
import jax.numpy as jnp
from jax import lax
from jax.experimental import pallas as pl
from jax.experimental.pallas import tpu as pltpu

N_EMBD = 64
HIDDEN = 4 * N_EMBD  # 256


def _round_up(a, b):
    return (a + b - 1) // b * b


def _ffn_kernel(x_ref, w1_ref, b1_ref, w2_ref, b2_ref, o_ref, *, sub_h, n_sub, unroll):
    # x_ref : (tile_m//2, 2C) in x.dtype; packed row r = [row 2r | row 2r+1]
    # w1_ref: (2C, 2H) bf16 block-diag(W1, W1),  b1_ref: (1, 2H) f32 = [b1 | b1]
    # w2_ref: (2H, 2C) bf16 block-diag(W2, W2),  b2_ref: (1, 2C) f32 = [b2 | b2]
    # o_ref : (tile_m//2, 2C) bf16 (or requested out dtype), same packing as x_ref
    w1 = w1_ref[...]
    w2 = w2_ref[...]
    b1 = b1_ref[...]
    b2 = b2_ref[...]

    def body(s, carry):
        r = pl.multiple_of(s * sub_h, sub_h)
        xp = x_ref[pl.ds(r, sub_h), :].astype(w1.dtype)               # (sub_h, 2C) bf16
        h = jnp.dot(xp, w1, preferred_element_type=jnp.float32) + b1  # (sub_h, 2H) f32
        h = jnp.maximum(h, 0.0).astype(w2.dtype)                      # ReLU, bf16
        y = jnp.dot(h, w2, preferred_element_type=jnp.float32) + b2   # (sub_h, 2C) f32
        o_ref[pl.ds(r, sub_h), :] = y.astype(o_ref.dtype)
        return carry

    lax.fori_loop(0, n_sub, body, 0, unroll=unroll)
    # TODO(synk): nn.Dropout(p=0.0) is the identity; a nonzero-p training-mode
    # dropout would use pltpu.prng_seed + pltpu.prng_random_bits here.


def feedforward(x, w1, b1, w2, b2, *, tile_m=4096, sub_m=128, out_dtype=jnp.bfloat16):
    """x: (B, T, C) -> (B, T, C) in `out_dtype` (bf16 by default, straight from
    the kernel -- no wrapper-side cast pass).  Weights are stored (in, out) so
    the kernel computes x @ W (PyTorch Linear is x @ W.T + b).

    Tuning: tile_m ~2048 on v5e, 4096-8192 on v6e/v7x (per-step VMEM is only a
    few MiB, so even 8192 rows fits every generation comfortably).
    """
    B, T, C = x.shape
    H = w1.shape[-1]
    assert w1.shape == (C, H) and w2.shape == (H, C)
    assert (2 * C) % 128 == 0 and (2 * H) % 128 == 0, "needs 2*C, 2*H % 128 == 0"
    M = B * T

    # ---- tile sizing (rows). 32-row alignment covers bf16 sublane packing of
    # the half-width packed rows; sub_m | tile_m; >=2 grid steps when there is
    # enough work so both v7x TensorCores are used.
    M_pad0 = _round_up(M, 32)
    tile_m = _round_up(max(32, min(tile_m, M_pad0)), 32)
    sub_m = _round_up(max(32, min(sub_m, tile_m)), 32)
    tile_m = _round_up(tile_m, sub_m)
    n_steps = pl.cdiv(M_pad0, tile_m)
    if n_steps == 1 and M_pad0 >= 4 * sub_m:
        n_steps = 2
    tile_m = _round_up(pl.cdiv(M_pad0, n_steps), sub_m)
    M_pad = n_steps * tile_m
    half_tile = tile_m // 2
    sub_h = sub_m // 2
    n_sub = tile_m // sub_m
    unroll = max(1, min(4, n_sub))

    # ---- input: keep original dtype (cast to bf16 in-kernel), lane-dense
    # row-pair packing (M/2, 2C).  Pad only if M isn't already tile-aligned.
    x2 = x.reshape(M, C)
    if M_pad != M:
        x2 = jnp.pad(x2, ((0, M_pad - M), (0, 0)))
    xp = x2.reshape(M_pad // 2, 2 * C)

    # ---- block-diagonal packed weights (built once; tiny: ~128 KiB each).
    w1b = w1.astype(jnp.bfloat16)
    w2b = w2.astype(jnp.bfloat16)
    z1 = jnp.zeros_like(w1b)
    z2 = jnp.zeros_like(w2b)
    w1p = jnp.concatenate(
        [jnp.concatenate([w1b, z1], axis=1),
         jnp.concatenate([z1, w1b], axis=1)], axis=0)          # (2C, 2H)
    w2p = jnp.concatenate(
        [jnp.concatenate([w2b, z2], axis=1),
         jnp.concatenate([z2, w2b], axis=1)], axis=0)          # (2H, 2C)
    b1p = jnp.tile(b1.reshape(1, H).astype(jnp.float32), (1, 2))   # (1, 2H)
    b2p = jnp.tile(b2.reshape(1, C).astype(jnp.float32), (1, 2))   # (1, 2C)

    kernel = functools.partial(_ffn_kernel, sub_h=sub_h, n_sub=n_sub, unroll=unroll)

    # Effective MXU flops (block-diag doubles the systolic work) + bf16 output.
    flops = 8 * M_pad * C * H
    bytes_accessed = (xp.size * x.dtype.itemsize + M_pad * C * jnp.dtype(out_dtype).itemsize
                      + w1p.size * 2 + w2p.size * 2 + b1p.size * 4 + b2p.size * 4)

    out = pl.pallas_call(
        kernel,
        out_shape=jax.ShapeDtypeStruct((M_pad // 2, 2 * C), out_dtype),
        grid_spec=pltpu.PrefetchScalarGridSpec(
            num_scalar_prefetch=0,
            grid=(n_steps,),
            in_specs=[
                pl.BlockSpec((half_tile, 2 * C), lambda i: (i, 0)),   # packed x tile
                pl.BlockSpec((2 * C, 2 * H), lambda i: (0, 0)),       # W1p (resident)
                pl.BlockSpec((1, 2 * H), lambda i: (0, 0)),           # b1p
                pl.BlockSpec((2 * H, 2 * C), lambda i: (0, 0)),       # W2p (resident)
                pl.BlockSpec((1, 2 * C), lambda i: (0, 0)),           # b2p
            ],
            out_specs=pl.BlockSpec((half_tile, 2 * C), lambda i: (i, 0)),
        ),
        compiler_params=pltpu.CompilerParams(
            dimension_semantics=("parallel",),
            vmem_limit_bytes=32 * 1024 * 1024,
        ),
        cost_estimate=pl.CostEstimate(
            flops=flops, transcendentals=0, bytes_accessed=bytes_accessed),
    )(xp, w1p, b1p, w2p, b2p)

    y = out.reshape(M_pad, C)[:M]
    return y.reshape(B, T, C)


def init_params(key, n_embd=N_EMBD, dtype=jnp.float32):
    """Deterministic synthetic params (PyTorch Linear init range), stored (in, out)."""
    k1, k2, k3, k4 = jax.random.split(key, 4)
    hidden = 4 * n_embd
    bound1 = 1.0 / (n_embd ** 0.5)
    bound2 = 1.0 / (hidden ** 0.5)
    w1 = jax.random.uniform(k1, (n_embd, hidden), dtype, -bound1, bound1)
    b1 = jax.random.uniform(k2, (1, hidden), dtype, -bound1, bound1)
    w2 = jax.random.uniform(k3, (hidden, n_embd), dtype, -bound2, bound2)
    b2 = jax.random.uniform(k4, (1, n_embd), dtype, -bound2, bound2)
    return w1, b1, w2, b2


if __name__ == "__main__":
    key = jax.random.PRNGKey(0)
    kx, kp = jax.random.split(key)

    B, T, C = 2, 8, N_EMBD
    x = jax.random.normal(kx, (B, T, C), dtype=jnp.float32)
    w1, b1, w2, b2 = init_params(kp)

    y = feedforward(x, w1, b1, w2, b2)
    jax.block_until_ready(y)

    # Pure-JAX reference mirroring the kernel's bf16 casts (weights, hidden,
    # and bf16 output), f32 accumulation.
    xb = x.reshape(-1, C).astype(jnp.bfloat16).astype(jnp.float32)
    w1f = w1.astype(jnp.bfloat16).astype(jnp.float32)
    w2f = w2.astype(jnp.bfloat16).astype(jnp.float32)
    h = jnp.maximum(xb @ w1f + b1.reshape(1, -1).astype(jnp.float32), 0.0)
    h = h.astype(jnp.bfloat16).astype(jnp.float32)
    ref = (h @ w2f + b2.reshape(1, -1).astype(jnp.float32))
    ref = ref.astype(jnp.bfloat16).reshape(B, T, C)

    assert y.shape == (B, T, C)
    assert y.dtype == jnp.bfloat16
    err = float(jnp.max(jnp.abs(y.astype(jnp.float32) - ref.astype(jnp.float32))))
    assert err < 2e-2, f"max abs err {err}"

    print("KERNEL_OK")
</pallas_src>

<mosaic_0001>
module attributes {stable_mosaic.version = 11 : i64} {
  func.func @_ffn_kernel(%arg0: i32, %arg1: memref<16x128xf32, #tpu.memory_space<vmem>>, %arg2: memref<128x512xbf16, #tpu.memory_space<vmem>>, %arg3: memref<1x512xf32, #tpu.memory_space<vmem>>, %arg4: memref<512x128xbf16, #tpu.memory_space<vmem>>, %arg5: memref<1x128xf32, #tpu.memory_space<vmem>>, %arg6: memref<16x128xbf16, #tpu.memory_space<vmem>>) attributes {dimension_semantics = [#tpu.dimension_semantics<parallel>], iteration_bounds = array<i64: 1>, scalar_prefetch = 0 : i64, scratch_operands = 0 : i64, tpu.core_type = #tpu.core_type<tc>, window_params = [{transform_indices = @transform_0, window_bounds = array<i64: 16, 128>}, {pipeline_mode = #tpu.pipeline_mode<synchronous>, transform_indices = @transform_1, window_bounds = array<i64: 128, 512>}, {pipeline_mode = #tpu.pipeline_mode<synchronous>, transform_indices = @transform_2, window_bounds = array<i64: 1, 512>}, {pipeline_mode = #tpu.pipeline_mode<synchronous>, transform_indices = @transform_3, window_bounds = array<i64: 512, 128>}, {pipeline_mode = #tpu.pipeline_mode<synchronous>, transform_indices = @transform_4, window_bounds = array<i64: 1, 128>}, {transform_indices = @transform_5, window_bounds = array<i64: 16, 128>}]} {
    %c0 = arith.constant 0 : index
    %c0_0 = arith.constant 0 : index
    %0 = vector.load %arg2[%c0, %c0_0] : memref<128x512xbf16, #tpu.memory_space<vmem>>, vector<128x512xbf16>
    %c0_1 = arith.constant 0 : index
    %c0_2 = arith.constant 0 : index
    %1 = vector.load %arg4[%c0_1, %c0_2] : memref<512x128xbf16, #tpu.memory_space<vmem>>, vector<512x128xbf16>
    %c0_3 = arith.constant 0 : index
    %c0_4 = arith.constant 0 : index
    %2 = vector.load %arg3[%c0_3, %c0_4] : memref<1x512xf32, #tpu.memory_space<vmem>>, vector<1x512xf32>
    %c0_5 = arith.constant 0 : index
    %c0_6 = arith.constant 0 : index
    %3 = vector.load %arg5[%c0_5, %c0_6] : memref<1x128xf32, #tpu.memory_space<vmem>>, vector<1x128xf32>
    %c0_i32 = arith.constant 0 : i32
    %c16_i32 = arith.constant 16 : i32
    %4 = arith.muli %c0_i32, %c16_i32 : i32
    %5 = tpu.assume_multiple %4, 16 : i32
    %6 = arith.index_cast %5 : i32 to index
    %c0_7 = arith.constant 0 : index
    %7 = vector.load %arg1[%6, %c0_7] : memref<16x128xf32, #tpu.memory_space<vmem>>, vector<16x128xf32>
    %8 = arith.truncf %7 : vector<16x128xf32> to vector<16x128xbf16>
    %cst = arith.constant dense<0.000000e+00> : vector<16x512xf32>
    %9 = tpu.matmul %8, %0, %cst {dimension_numbers = #tpu.dot_dimension_numbers<[1], [0], [0], [1], [0, 0, 1, 1], [], []>} : vector<16x128xbf16>, vector<128x512xbf16>, vector<16x512xf32> -> vector<16x512xf32>
    %10 = vector.broadcast %2 : vector<1x512xf32> to vector<16x512xf32>
    %11 = arith.addf %9, %10 : vector<16x512xf32>
    %cst_8 = arith.constant 0.000000e+00 : f32
    %12 = vector.broadcast %cst_8 : f32 to vector<16x512xf32>
    %13 = arith.maximumf %11, %12 : vector<16x512xf32>
    %14 = arith.truncf %13 : vector<16x512xf32> to vector<16x512xbf16>
    %cst_9 = arith.constant dense<0.000000e+00> : vector<16x128xf32>
    %15 = tpu.matmul %14, %1, %cst_9 {dimension_numbers = #tpu.dot_dimension_numbers<[1], [0], [0], [1], [0, 0, 1, 1], [], []>} : vector<16x512xbf16>, vector<512x128xbf16>, vector<16x128xf32> -> vector<16x128xf32>
    %16 = vector.broadcast %3 : vector<1x128xf32> to vector<16x128xf32>
    %17 = arith.addf %15, %16 : vector<16x128xf32>
    %18 = arith.truncf %17 : vector<16x128xf32> to vector<16x128xbf16>
    %19 = arith.index_cast %5 : i32 to index
    %c0_10 = arith.constant 0 : index
    %20 = vector.load %arg6[%19, %c0_10] : memref<16x128xbf16, #tpu.memory_space<vmem>>, vector<16x128xbf16>
    tpu.vector_store %arg6[%19, %c0_10], %18 {strides = array<i32>} : memref<16x128xbf16, #tpu.memory_space<vmem>>, vector<16x128xbf16>,
    %c1_i32 = arith.constant 1 : i32
    return
  }
  func.func @transform_0(%arg0: i32) -> (i32, i32) {
    %c0_i32 = arith.constant 0 : i32
    %c0_i32_0 = arith.constant 0 : i32
    return %arg0, %c0_i32 : i32, i32
  }
  func.func @transform_1(%arg0: i32) -> (i32, i32) {
    %c0_i32 = arith.constant 0 : i32
    %c0_i32_0 = arith.constant 0 : i32
    %c0_i32_1 = arith.constant 0 : i32
    return %c0_i32, %c0_i32_0 : i32, i32
  }
  func.func @transform_2(%arg0: i32) -> (i32, i32) {
    %c0_i32 = arith.constant 0 : i32
    %c0_i32_0 = arith.constant 0 : i32
    %c0_i32_1 = arith.constant 0 : i32
    return %c0_i32, %c0_i32_0 : i32, i32
  }
  func.func @transform_3(%arg0: i32) -> (i32, i32) {
    %c0_i32 = arith.constant 0 : i32
    %c0_i32_0 = arith.constant 0 : i32
    %c0_i32_1 = arith.constant 0 : i32
    return %c0_i32, %c0_i32_0 : i32, i32
  }
  func.func @transform_4(%arg0: i32) -> (i32, i32) {
    %c0_i32 = arith.constant 0 : i32
    %c0_i32_0 = arith.constant 0 : i32
    %c0_i32_1 = arith.constant 0 : i32
    return %c0_i32, %c0_i32_0 : i32, i32
  }
  func.func @transform_5(%arg0: i32) -> (i32, i32) {
    %c0_i32 = arith.constant 0 : i32
    %c0_i32_0 = arith.constant 0 : i32
    return %arg0, %c0_i32 : i32, i32
  }
}

</mosaic_0001>

<bundles_post_ra>
// kernel: tpu_custom_call.1
= control target key start
LH: loop header
LB: loop body
LE: loop exit
PB: predicated region body
PF: predicated region fallthrough
CT: control target
= control target key end

     0   :  { %10 = vsyncpa [#allocation3], 0  ;;  %s1155_s0 = inlined_call_operand.hbm [shape: f32[16,128], index: 0, kind: input, shape index: {}]   ;;  %s1156_s1 = inlined_call_operand.hbm [shape: bf16[128,512], index: 1, kind: input, shape index: {}]   ;;  %s1157_s2 = inlined_call_operand.vmem [shape: f32[1,512], index: 2, kind: input, shape index: {}]   ;;  %s1158_s3 = inlined_call_operand.hbm [shape: bf16[512,128], index: 3, kind: input, shape index: {}]   ;;  %s1159_s4 = inlined_call_operand.vmem [shape: f32[1,128], index: 4, kind: input, shape index: {}]   ;;  %s1160_s5 = inlined_call_operand.hbm [shape: bf16[16,128], index: 5, kind: output, shape index: {}]  }
   0x1   :  { %11 = vsyncpa [#allocation6], 0 }
   0x2   :  { %12 = vsyncpa [#allocation4], 0  ;;  %s1054_s18 = smov [#allocation5]   ;;  %s960_s22 = scalar_lea.hbm %s1156_s1, 4096 }
   0x3   :  { %s30_s19 = sshll.u32 %s1054_s18, 4  ;;  %p961_p0 = scmp.ne.s32.totalorder %s1156_s1, %s960_s22  ;;  %s31_s19 = int_to_ptr.vmem [resolvable:$true] %s30_s19 }
   0x4   :  { %p964_p1 = scmp.lt.u32.totalorder %s960_s22, %s1156_s1 }
   0x6   :  { %p966_p2 = pnand %p964_p1, %p961_p0 }
   0x8   :  { %969 = shalt.err (!%p966_p2)
}
   0x9   :  { %s970_s27 = scalar_lea.vmem %s31_s19, 4096  ;;  %p975_p4 = scmp.lt.s32.totalorder %s31_s19, %s31_s19 }
   0xa   :  { %p971_p3 = scmp.ne.s32.totalorder %s31_s19, %s970_s27  ;;  %p976_p5 = scmp.lt.s32.totalorder %s970_s27, %s970_s27 }
   0xc   :  { %p977_p6 = por %p976_p5, %p975_p4 }
   0xe   :  { %p978_p7 = pnand %p977_p6, %p971_p3 }
  0x10   :  { %981 = shalt.err (!%p978_p7)
}
  0x11   :  { %s1055_s28 = smov 256   ;;  %s1056_s29 = smov 16  }
  0x12   :  { %36 = dma.hbm_to_vmem [thread:$0]  %s1156_s1, 4096, %s31_s19, [#allocation6], %s1055_s28, %s1055_s28, %s1056_s29  }
  0x13   :  { %s1057_s7 = smov [#allocation2]   ;;  %s982_s11 = scalar_lea.hbm %s1155_s0, 256 }
  0x14   :  { %s18_s8 = sshll.u32 %s1057_s7, 4  ;;  %p983_p8 = scmp.ne.s32.totalorder %s1155_s0, %s982_s11  ;;  %s19_s8 = int_to_ptr.vmem [resolvable:$true] %s18_s8 }
  0x15   :  { %p986_p9 = scmp.lt.u32.totalorder %s982_s11, %s1155_s0 }
  0x17   :  { %p988_p10 = pnand %p986_p9, %p983_p8 }
  0x19   :  { %991 = shalt.err (!%p988_p10)
}
  0x1a   :  { %s992_s16 = scalar_lea.vmem %s19_s8, 256  ;;  %p997_p12 = scmp.lt.s32.totalorder %s19_s8, %s19_s8 }
  0x1b   :  { %p993_p11 = scmp.ne.s32.totalorder %s19_s8, %s992_s16  ;;  %p998_p13 = scmp.lt.s32.totalorder %s992_s16, %s992_s16 }
  0x1d   :  { %p999_p0 = por %p998_p13, %p997_p12 }
  0x1f   :  { %p1000_p1 = pnand %p999_p0, %p993_p11 }
  0x21   :  { %1003 = shalt.err (!%p1000_p1)
}
  0x22   :  { %s1058_s1 = smov 128   ;;  %s1059_s17 = smov 8  }
  0x23   :  { %24 = dma.hbm_to_vmem [thread:$0]  %s1155_s0, 256, %s19_s8, [#allocation3], %s1058_s1, %s1058_s1, %s1059_s17  }
  0x24   :  { %s1060_s20 = smov [#allocation7]   ;;  %s1004_s24 = scalar_lea.hbm %s1158_s3, 4096 }
  0x25   :  { %s44_s21 = sshll.u32 %s1060_s20, 4  ;;  %p1005_p2 = scmp.ne.s32.totalorder %s1158_s3, %s1004_s24  ;;  %s45_s21 = int_to_ptr.vmem [resolvable:$true] %s44_s21 }
  0x26   :  { %p1008_p3 = scmp.lt.u32.totalorder %s1004_s24, %s1158_s3 }
  0x28   :  { %p1010_p4 = pnand %p1008_p3, %p1005_p2 }
  0x2a   :  { %1013 = shalt.err (!%p1010_p4)
}
  0x2b   :  { %s1014_s29 = scalar_lea.vmem %s45_s21, 4096  ;;  %p1019_p6 = scmp.lt.s32.totalorder %s45_s21, %s45_s21 }
  0x2c   :  { %p1015_p5 = scmp.ne.s32.totalorder %s45_s21, %s1014_s29  ;;  %p1020_p7 = scmp.lt.s32.totalorder %s1014_s29, %s1014_s29 }
  0x2e   :  { %p1021_p8 = por %p1020_p7, %p1019_p6 }
  0x30   :  { %p1022_p9 = pnand %p1021_p8, %p1015_p5 }
  0x32   :  { %1025 = shalt.err (!%p1022_p9)
}
  0x33   :  { %s1061_s0 = smov 64   ;;  %s1062_s30 = smov 4  }
  0x34   :  { %50 = dma.hbm_to_vmem [thread:$0]  %s1158_s3, 4096, %s45_s21, [#allocation6], %s1061_s0, %s1061_s0, %s1062_s30  }
  0x35   :  { %1048 = dma.done.wait [#allocation3], 256  }
  0x36   :  { %1049 = vsyncadd [#allocation3], 4294967040 }
  0x37   :  { %1050 = dma.done.wait [#allocation6], 8192  }
  0x38   :  { %1051 = vsyncadd [#allocation6], 4294959104  ;;  %v1063_v0 = vmov 0   ;;  %v880_v1 = vld [vmem:[#allocation5 + $0x4] ss:$16 sps:$4 sm:$0xff]   ;;  %v162_v34 = vld [vmem:[#allocation2 + $0x8] sm:$0xff] }
  0x39   :  { %377 = vmatprep.mubr.bf16.mxu0 %v1063_v0  ;;  %420 = vmatprep.mubr.bf16.mxu1 %v1063_v0  ;;  %v882_v2 = vld [vmem:[#allocation5 + $0xc] ss:$16 sps:$4 sm:$0xff]   ;;  %v884_v3 = vld [vmem:[#allocation5] ss:$16 sps:$4 sm:$0xff]   ;;  %v885_v4 = vld [vmem:[#allocation5 + $0x8] ss:$16 sps:$4 sm:$0xff]  }
  0x3a   :  { %345 = vmatprep.subr.bf16.mxu0 %v880_v1  ;;  %388 = vmatprep.subr.bf16.mxu1 %v882_v2  ;;  %v886_v5 = vld [vmem:[#allocation5 + $0x24] ss:$16 sps:$4 sm:$0xff]   ;;  %v888_v6 = vld [vmem:[#allocation5 + $0x2c] ss:$16 sps:$4 sm:$0xff]   ;;  %v890_v7 = vld [vmem:[#allocation5 + $0x20] ss:$16 sps:$4 sm:$0xff]  }
  0x3b   :  { %346 = vmatpush1.bf16.msra.mxu0 %v884_v3  ;;  %389 = vmatpush1.bf16.msra.mxu1 %v885_v4  ;;  %v891_v8 = vld [vmem:[#allocation5 + $0x28] ss:$16 sps:$4 sm:$0xff]   ;;  %v892_v9 = vld [vmem:[#allocation5 + $0x44] ss:$16 sps:$4 sm:$0xff]   ;;  %v894_v10 = vld [vmem:[#allocation5 + $0x4c] ss:$16 sps:$4 sm:$0xff]   ;;  %v165_v4 = vlaneseq }
  0x3c   :  { %347 = vmatprep.subr.bf16.mxu0 %v886_v5  ;;  %390 = vmatprep.subr.bf16.mxu1 %v888_v6  ;;  %v896_v11 = vld [vmem:[#allocation5 + $0x40] ss:$16 sps:$4 sm:$0xff]   ;;  %v897_v12 = vld [vmem:[#allocation5 + $0x48] ss:$16 sps:$4 sm:$0xff]   ;;  %v898_v13 = vld [vmem:[#allocation5 + $0x64] ss:$16 sps:$4 sm:$0xff]  }
  0x3d   :  { %v900_v14 = vld [vmem:[#allocation5 + $0x6c] ss:$16 sps:$4 sm:$0xff]   ;;  %v902_v15 = vld [vmem:[#allocation5 + $0x60] ss:$16 sps:$4 sm:$0xff]   ;;  %v903_v16 = vld [vmem:[#allocation5 + $0x68] ss:$16 sps:$4 sm:$0xff]  }
  0x3e   :  { %v904_v17 = vld [vmem:[#allocation5 + $0x84] ss:$16 sps:$4 sm:$0xff]   ;;  %v906_v18 = vld [vmem:[#allocation5 + $0x8c] ss:$16 sps:$4 sm:$0xff]   ;;  %v908_v19 = vld [vmem:[#allocation5 + $0x80] ss:$16 sps:$4 sm:$0xff]  }
  0x3f   :  { %348 = vmatpush1.bf16.msra.mxu0 %v890_v7  ;;  %391 = vmatpush1.bf16.msra.mxu1 %v891_v8  ;;  %v909_v20 = vld [vmem:[#allocation5 + $0x88] ss:$16 sps:$4 sm:$0xff]   ;;  %v910_v21 = vld [vmem:[#allocation5 + $0xa4] ss:$16 sps:$4 sm:$0xff]   ;;  %v912_v22 = vld [vmem:[#allocation5 + $0xac] ss:$16 sps:$4 sm:$0xff]  }
  0x40   :  { %349 = vmatprep.subr.bf16.mxu0 %v892_v9  ;;  %392 = vmatprep.subr.bf16.mxu1 %v894_v10  ;;  %v914_v23 = vld [vmem:[#allocation5 + $0xa0] ss:$16 sps:$4 sm:$0xff]   ;;  %v915_v24 = vld [vmem:[#allocation5 + $0xa8] ss:$16 sps:$4 sm:$0xff]   ;;  %v916_v25 = vld [vmem:[#allocation5 + $0xc4] ss:$16 sps:$4 sm:$0xff]  }
  0x41   :  { %v918_v26 = vld [vmem:[#allocation5 + $0xcc] ss:$16 sps:$4 sm:$0xff]   ;;  %v920_v27 = vld [vmem:[#allocation5 + $0xc0] ss:$16 sps:$4 sm:$0xff]   ;;  %v921_v28 = vld [vmem:[#allocation5 + $0xc8] ss:$16 sps:$4 sm:$0xff]  }
  0x42   :  { %v922_v29 = vld [vmem:[#allocation5 + $0xe4] ss:$16 sps:$4 sm:$0xff]   ;;  %v924_v30 = vld [vmem:[#allocation5 + $0xec] ss:$16 sps:$4 sm:$0xff]   ;;  %v926_v31 = vld [vmem:[#allocation5 + $0xe0] ss:$16 sps:$4 sm:$0xff]  }
  0x43   :  { %350 = vmatpush1.bf16.msra.mxu0 %v896_v11  ;;  %393 = vmatpush1.bf16.msra.mxu1 %v897_v12  ;;  %v927_v32 = vld [vmem:[#allocation5 + $0xe8] ss:$16 sps:$4 sm:$0xff]   ;;  %v161_v33 = vld [vmem:[#allocation2] sm:$0xff]  ;;  %v928_v35 = vld [vmem:[#allocation7 + $0x40] sm:$0xff]   ;;  %v166_v5 = vshrl.u32 %v165_v4, 7  ;;  %s1064_s10 = smov [#allocation8]  }
  0x44   :  { %351 = vmatprep.subr.bf16.mxu0 %v898_v13  ;;  %394 = vmatprep.subr.bf16.mxu1 %v900_v14  ;;  %v929_v36 = vld [vmem:[#allocation7 + $0xc0] sm:$0xff]   ;;  %v163_v38 = vpack.c.bf16 %v162_v34, %v161_v33  ;;  %v932_v40 = vld [vmem:[#allocation7 + $0x48] sm:$0xff]   ;;  %v936_v44 = vld [vmem:[#allocation7 + $0x50] sm:$0xff]   ;;  %s738_s11 = sshll.u32 %s1064_s10, 4  ;;  %s739_s11 = int_to_ptr.vmem [resolvable:$true] %s738_s11 }
  0x45   :  { %v930_v37 = vld [vmem:[#allocation7] sm:$0xff]   ;;  %v933_v41 = vld [vmem:[#allocation7 + $0xc8] sm:$0xff]   ;;  %v937_v45 = vld [vmem:[#allocation7 + $0xd0] sm:$0xff]   ;;  %v167_v6 = vsub.s32 0, %v166_v5  ;;  %v175_v7 = vsub.s32 2, %v166_v5  ;;  %v171_v9 = vsub.s32 1, %v166_v5  ;;  %p1031_p11 = scmp.lt.s32.totalorder %s739_s11, %s739_s11 }
  0x46   :  { %v931_v39 = vld [vmem:[#allocation7 + $0x80] sm:$0xff]   ;;  %v934_v42 = vld [vmem:[#allocation7 + $0x8] sm:$0xff]   ;;  %v938_v46 = vld [vmem:[#allocation7 + $0x10] sm:$0xff]   ;;  %v179_v10 = vsub.s32 3, %v166_v5 }
  0x47   :  { %352 = vmatpush1.bf16.msra.mxu0 %v902_v15  ;;  %395 = vmatpush1.bf16.msra.mxu1 %v903_v16  ;;  %v935_v43 = vld [vmem:[#allocation7 + $0x88] sm:$0xff]   ;;  %v939_v47 = vld [vmem:[#allocation7 + $0x90] sm:$0xff]   ;;  %v940_v48 = vld [vmem:[#allocation7 + $0x58] sm:$0xff]  }
  0x48   :  { %353 = vmatprep.subr.bf16.mxu0 %v904_v17  ;;  %396 = vmatprep.subr.bf16.mxu1 %v906_v18  ;;  %v941_v49 = vld [vmem:[#allocation7 + $0xd8] sm:$0xff]   ;;  %v944_v52 = vld [vmem:[#allocation7 + $0x60] sm:$0xff]   ;;  %v948_v56 = vld [vmem:[#allocation7 + $0x68] sm:$0xff]  }
  0x49   :  { %v942_v50 = vld [vmem:[#allocation7 + $0x18] sm:$0xff]   ;;  %v945_v53 = vld [vmem:[#allocation7 + $0xe0] sm:$0xff]   ;;  %v949_v57 = vld [vmem:[#allocation7 + $0xe8] sm:$0xff]  }
  0x4a   :  { %v943_v51 = vld [vmem:[#allocation7 + $0x98] sm:$0xff]   ;;  %v946_v54 = vld [vmem:[#allocation7 + $0x20] sm:$0xff]   ;;  %v950_v58 = vld [vmem:[#allocation7 + $0x28] sm:$0xff]  }
  0x4b   :  { %354 = vmatpush1.bf16.msra.mxu0 %v908_v19  ;;  %397 = vmatpush1.bf16.msra.mxu1 %v909_v20  ;;  %v947_v55 = vld [vmem:[#allocation7 + $0xa0] sm:$0xff]   ;;  %v951_v59 = vld [vmem:[#allocation7 + $0xa8] sm:$0xff]   ;;  %v952_v60 = vld [vmem:[#allocation7 + $0x70] sm:$0xff]  }
  0x4c   :  { %355 = vmatprep.subr.bf16.mxu0 %v910_v21  ;;  %398 = vmatprep.subr.bf16.mxu1 %v912_v22  ;;  %v953_v61 = vld [vmem:[#allocation7 + $0xf0] sm:$0xff]   ;;  %v956_v0 = vld [vmem:[#allocation7 + $0x78] sm:$0xff]  }
  0x4d   :  { %v954_v62 = vld [vmem:[#allocation7 + $0x30] sm:$0xff]   ;;  %v957_v1 = vld [vmem:[#allocation7 + $0xf8] sm:$0xff]  }
  0x4e   :  { %v955_v63 = vld [vmem:[#allocation7 + $0xb0] sm:$0xff]   ;;  %v958_v2 = vld [vmem:[#allocation7 + $0x38] sm:$0xff]  }
  0x4f   :  { %356 = vmatpush1.bf16.msra.mxu0 %v914_v23  ;;  %399 = vmatpush1.bf16.msra.mxu1 %v915_v24  ;;  %v959_v3 = vld [vmem:[#allocation7 + $0xb8] sm:$0xff]   ;;  %v159_v8 = vld [vmem:[%s1157_s2] sm:$0xf] }
  0x50   :  { %357 = vmatprep.subr.bf16.mxu0 %v916_v25  ;;  %400 = vmatprep.subr.bf16.mxu1 %v918_v26  ;;  %v168_v11 = vrot.slane %v159_v8, %v167_v6  ;;  %v176_v12 = vrot.slane %v159_v8, %v175_v7  ;;  %v172_v13 = vrot.slane %v159_v8, %v171_v9 }
  0x51   :  { %v180_v14 = vrot.slane %v159_v8, %v179_v10 }
  0x53   :  { %358 = vmatpush1.bf16.msra.mxu0 %v920_v27  ;;  %401 = vmatpush1.bf16.msra.mxu1 %v921_v28 }
  0x54   :  { %359 = vmatprep.subr.bf16.mxu0 %v922_v29  ;;  %402 = vmatprep.subr.bf16.mxu1 %v924_v30 }
  0x57   :  { %360 = vmatpush1.bf16.msra.mxu0 %v926_v31  ;;  %403 = vmatpush1.bf16.msra.mxu1 %v927_v32 }
  0x58   :  { %825 = vmatprep.subr.bf16.mxu0 %v928_v35  ;;  %847 = vmatprep.subr.bf16.mxu1 %v929_v36 }
  0x5a   :  { %378 = vmatmul.mubr.bf16.vlgmr.msra.gmra.mrb[0].mxu0 %v163_v38  ;;  %421 = vmatmul.mubr.bf16.vlgmr.msra.gmra.mrb[0].mxu1 %v163_v38 }
  0x5b   :  { %826 = vmatpush3.bf16.msra.mxu0 %v930_v37  ;;  %848 = vmatpush3.bf16.msra.mxu1 %v931_v39 }
  0x5c   :  { %827 = vmatprep.subr.bf16.mxu0 %v932_v40  ;;  %849 = vmatprep.subr.bf16.mxu1 %v933_v41 }
  0x5f   :  { %828 = vmatpush3.bf16.msra.mxu0 %v934_v42  ;;  %850 = vmatpush3.bf16.msra.mxu1 %v935_v43 }
  0x60   :  { %829 = vmatprep.subr.bf16.mxu0 %v936_v44  ;;  %851 = vmatprep.subr.bf16.mxu1 %v937_v45  ;;  %v783_v45 = vld [vmem:[%s1159_s4] ss:$0 sm:$0xff]  ;;  %s1026_s4 = scalar_lea.vmem %s739_s11, 128 }
  0x61   :  { %p1027_p10 = scmp.ne.s32.totalorder %s739_s11, %s1026_s4  ;;  %p1032_p12 = scmp.lt.s32.totalorder %s1026_s4, %s1026_s4 }
  0x63   :  { %830 = vmatpush3.bf16.msra.mxu0 %v938_v46  ;;  %852 = vmatpush3.bf16.msra.mxu1 %v939_v47  ;;  %p1033_p13 = por %p1032_p12, %p1031_p11 }
  0x64   :  { %831 = vmatprep.subr.bf16.mxu0 %v940_v48  ;;  %853 = vmatprep.subr.bf16.mxu1 %v941_v49 }
  0x65   :  { %p1034_p0 = pnand %p1033_p13, %p1027_p10 }
  0x67   :  { %832 = vmatpush3.bf16.msra.mxu0 %v942_v50  ;;  %854 = vmatpush3.bf16.msra.mxu1 %v943_v51 }
  0x68   :  { %833 = vmatprep.subr.bf16.mxu0 %v944_v52  ;;  %855 = vmatprep.subr.bf16.mxu1 %v945_v53 }
  0x6b   :  { %834 = vmatpush3.bf16.msra.mxu0 %v946_v54  ;;  %856 = vmatpush3.bf16.msra.mxu1 %v947_v55 }
  0x6c   :  { %835 = vmatprep.subr.bf16.mxu0 %v948_v56  ;;  %857 = vmatprep.subr.bf16.mxu1 %v949_v57 }
  0x6f   :  { %836 = vmatpush3.bf16.msra.mxu0 %v950_v58  ;;  %858 = vmatpush3.bf16.msra.mxu1 %v951_v59 }
  0x70   :  { %837 = vmatprep.subr.bf16.mxu0 %v952_v60  ;;  %859 = vmatprep.subr.bf16.mxu1 %v953_v61 }
  0x73   :  { %838 = vmatpush3.bf16.msra.mxu0 %v954_v62  ;;  %860 = vmatpush3.bf16.msra.mxu1 %v955_v63 }
  0x74   :  { %839 = vmatprep.subr.bf16.mxu0 %v956_v0  ;;  %861 = vmatprep.subr.bf16.mxu1 %v957_v1 }
  0x77   :  { %840 = vmatpush3.bf16.msra.mxu0 %v958_v2  ;;  %862 = vmatpush3.bf16.msra.mxu1 %v959_v3 }
 0x12d   :  { %v379_v15 = vpop.f32.mrb[0].mxu0  ;;  %v422_v16 = vpop.f32.mrb[0].mxu1 }
 0x12e   :  { %v380_v17 = vadd.f32 %v379_v15, %v168_v11  ;;  %v423_v18 = vadd.f32 %v422_v16, %v176_v12  ;;  %v381_v19 = vpop.f32.mrb[1].mxu0  ;;  %v424_v20 = vpop.f32.mrb[1].mxu1 }
 0x12f   :  { %v382_v21 = vadd.f32 %v381_v19, %v172_v13  ;;  %v425_v22 = vadd.f32 %v424_v20, %v180_v14  ;;  %v383_v23 = vpop.f32.mrb[2].mxu0  ;;  %v426_v24 = vpop.f32.mrb[2].mxu1 }
 0x130   :  { %v433_v25 = vmax.f32 %v423_v18, 0.0  ;;  %v384_v26 = vadd.f32 %v383_v23, %v168_v11  ;;  %v427_v27 = vadd.f32 %v426_v24, %v176_v12  ;;  %v385_v28 = vpop.f32.mrb[3].mxu0  ;;  %v428_v29 = vpop.f32.mrb[3].mxu1  ;;  %v431_v33 = vmax.f32 %v380_v17, 0.0 }
 0x131   :  { %v434_v30 = vmax.f32 %v425_v22, 0.0  ;;  %v386_v31 = vadd.f32 %v385_v28, %v172_v13  ;;  %v429_v32 = vadd.f32 %v428_v29, %v180_v14  ;;  %v432_v36 = vmax.f32 %v382_v21, 0.0 }
 0x132   :  { %v435_v34 = vmax.f32 %v384_v26, 0.0  ;;  %v437_v35 = vmax.f32 %v427_v27, 0.0 }
 0x133   :  { %v436_v37 = vmax.f32 %v386_v31, 0.0  ;;  %v438_v38 = vmax.f32 %v429_v32, 0.0 }
 0x134   :  { %v439_v39 = vpack.c.bf16 %v435_v34, %v431_v33  ;;  %v441_v40 = vpack.c.bf16 %v437_v35, %v433_v25 }
 0x135   :  { %v440_v41 = vpack.c.bf16 %v436_v37, %v432_v36  ;;  %v442_v42 = vpack.c.bf16 %v438_v38, %v434_v30 }
 0x137   :  { %673 = vmatprep.mubr.bf16.mxu0 %v440_v41  ;;  %714 = vmatprep.mubr.bf16.mxu1 %v442_v42 }
 0x138   :  { %674 = vmatmul.mubr.bf16.vlgmr.msra.gmra.mrb[4].mxu0 %v439_v39  ;;  %715 = vmatmul.mubr.bf16.vlgmr.msra.gmra.mrb[4].mxu1 %v441_v40 }
 0x20b   :  { %v841_v43 = vpop.f32.mrb[4].mxu0  ;;  %v863_v44 = vpop.f32.mrb[4].mxu1 }
 0x20c   :  { %v842_v46 = vpop.f32.mrb[5].mxu0  ;;  %v864_v47 = vpop.f32.mrb[5].mxu1 }
 0x20d   :  { %v843_v48 = vadd.f32 %v842_v46, %v841_v43  ;;  %v865_v49 = vadd.f32 %v864_v47, %v863_v44  ;;  %v844_v50 = vpop.f32.mrb[6].mxu0  ;;  %v866_v51 = vpop.f32.mrb[6].mxu1 }
 0x20e   :  { %v845_v52 = vpop.f32.mrb[7].mxu0  ;;  %v867_v53 = vpop.f32.mrb[7].mxu1 }
 0x20f   :  { %v676_v54 = vadd.f32 %v843_v48, %v783_v45  ;;  %v846_v55 = vadd.f32 %v845_v52, %v844_v50  ;;  %v868_v56 = vadd.f32 %v867_v53, %v866_v51 }
 0x211   :  { %v717_v57 = vadd.f32 %v865_v49, %v676_v54  ;;  %v679_v58 = vadd.f32 %v846_v55, %v783_v45 }
 0x213   :  { %v720_v59 = vadd.f32 %v868_v56, %v679_v58 }
 0x215   :  { %v823_v60 = vpack.c.bf16 %v720_v59, %v717_v57 }
 0x217   :  { %824 = vst [vmem:[#allocation8] sm:$0xff] %v823_v60  }
 0x218   :  { %1037 = shalt.err (!%p1034_p0)
}
 0x219   :  { %s1038_s14 = scalar_lea.hbm %s1160_s5, 128 }
 0x21a   :  { %p1039_p1 = scmp.ne.s32.totalorder %s1160_s5, %s1038_s14  ;;  %p1042_p2 = scmp.lt.u32.totalorder %s1038_s14, %s1160_s5 }
 0x21c   :  { %p1044_p3 = pnand %p1042_p2, %p1039_p1 }
 0x21e   :  { %1047 = shalt.err (!%p1044_p3)
}
 0x21f   :  { %744 = dma.vmem_to_hbm [thread:$0]  %s739_s11, 128, %s1160_s5, [#allocation4], %s1061_s0, %s1061_s0, %s1062_s30  }
 0x220   :  { %1052 = dma.done.wait [#allocation4], 128  }
 0x221   :  { %1053 = vsyncadd [#allocation4], 4294967168 }
 0x222   :  { %748 = vsyncpa [#allocation3], 1 }
 0x223   :  { %749 = vsyncpa [#allocation6], 1 }
 0x224   :  { %750 = vsyncpa [#allocation4], 1 }

</bundles_post_ra>
